<compile_context>
chip_gen: v7x
topology: tpu7x:2x2x1
jax: 0.10.0
libtpu: 0.0.40
codegen_flags: <defaults>
</compile_context>

<pallas_src>
import functools

import jax
import jax.numpy as jnp
from jax import lax
from jax.experimental import pallas as pl
from jax.experimental.pallas import tpu as pltpu
import numpy as np

_LANE = 128     # lane width (padded label / vocab axis)
_SUBLANE = 8    # f32 sublane count (batch padding)


def _ner_kernel(tok_ref, emb_ref, wih_ref, whh_ref, b_ref, wfc_ref, bfc_ref,
                out_ref, *, T, B, H):
    """Fused embedding + LSTM recurrence + fc + log_softmax.

    tok_ref : (T*B, 1)   int32  time-major flattened (batch-padded) token ids
    emb_ref : (VP, E)    f32    embedding table, vocab zero-padded to VP
    wih_ref : (E, 4H)    f32    transposed PyTorch weight_ih_l0
    whh_ref : (H, 4H)    f32    transposed PyTorch weight_hh_l0
    b_ref   : (1, 4H)    f32    bias_ih + bias_hh
    wfc_ref : (H, 128)   f32    transposed fc.weight, zero-padded to 128 lanes
    bfc_ref : (1, 128)   f32    fc.bias, padded lanes = -1e30
    out_ref : (T*B, 128) f32    log-scores (padded lanes ~ -1e30)
    """
    TB = T * B
    VP = emb_ref.shape[0]

    # --- In-kernel embedding lookup: one_hot(tokens) @ table on the MXU.
    tok = tok_ref[...]                                                # (TB, 1) int32
    vocab_iota = lax.broadcasted_iota(jnp.int32, (TB, VP), 1)
    onehot = (vocab_iota == tok).astype(jnp.float32)                  # (TB, VP)
    embeds = jnp.dot(onehot, emb_ref[...],
                     preferred_element_type=jnp.float32)              # (TB, E)

    # --- Hoisted input projection: ONE MXU matmul for all timesteps/rows.
    gates_x = (jnp.dot(embeds, wih_ref[...],
                       preferred_element_type=jnp.float32)
               + b_ref[...])                                          # (TB, 4H)

    whh = whh_ref[...]                                                # (H, 4H)
    wfc = wfc_ref[...]                                                # (H, 128)

    h = jnp.zeros((B, H), jnp.float32)
    c = jnp.zeros((B, H), jnp.float32)
    hs = []

    # --- Serial recurrence, fully unrolled (T small & static). Only h @ W_hh plus
    #     2 wide EUP ops + tanh(c) sit on the critical chain; h/c live in vregs.
    for t in range(T):
        gates = gates_x[t * B:(t + 1) * B, :] + jnp.dot(
            h, whh, preferred_element_type=jnp.float32)               # (B, 4H) i,f,g,o

        sg = jax.nn.sigmoid(gates)      # one EUP pass over all 4H lanes
        tg = jnp.tanh(gates)            # one EUP pass over all 4H lanes

        i_g = sg[:, 0:H]
        f_g = sg[:, H:2 * H]
        g_g = tg[:, 2 * H:3 * H]
        o_g = sg[:, 3 * H:4 * H]

        c = f_g * c + i_g * g_g
        h = o_g * jnp.tanh(c)
        hs.append(h)                    # stays in registers; no VMEM store

    # --- Hoisted fc + log_softmax over all rows at once; single unmasked store.
    hs_all = jnp.concatenate(hs, axis=0)                              # (TB, H)
    logits = (jnp.dot(hs_all, wfc, preferred_element_type=jnp.float32)
              + bfc_ref[...])                                         # (TB, 128)

    m = jnp.max(logits, axis=-1, keepdims=True)
    shifted = logits - m
    lse = jnp.log(jnp.sum(jnp.exp(shifted), axis=-1, keepdims=True))
    out_ref[...] = (shifted - lse).astype(out_ref.dtype)


def prepare_params(params):
    """One-time weight prep: transposes, bias fold, vocab/label padding.

    Returns (prepped_arrays_dict, num_labels).
    """
    emb = jnp.asarray(params["embedding"], jnp.float32)               # (V, E)
    w_ih = jnp.asarray(params["w_ih"], jnp.float32)                   # (4H, E)
    w_hh = jnp.asarray(params["w_hh"], jnp.float32)                   # (4H, H)
    b_ih = jnp.asarray(params["b_ih"], jnp.float32)                   # (4H,)
    b_hh = jnp.asarray(params["b_hh"], jnp.float32)                   # (4H,)
    w_fc = jnp.asarray(params["w_fc"], jnp.float32)                   # (L, H)
    b_fc = jnp.asarray(params["b_fc"], jnp.float32)                   # (L,)

    V, E = emb.shape
    H = w_hh.shape[1]
    L = w_fc.shape[0]
    VP = pl.cdiv(V, _LANE) * _LANE

    emb_pad = jnp.zeros((VP, E), jnp.float32).at[:V, :].set(emb)      # (VP, E)
    w_ih_t = w_ih.T                                                   # (E, 4H)
    w_hh_t = w_hh.T                                                   # (H, 4H)
    bias = (b_ih + b_hh)[None, :]                                     # (1, 4H)
    # Lane-dense fc: padded bias lanes get -1e30 -> exp() underflows to 0 in softmax.
    w_fc_pad = jnp.zeros((H, _LANE), jnp.float32).at[:, :L].set(w_fc.T)
    b_fc_pad = jnp.full((1, _LANE), -1e30, jnp.float32).at[0, :L].set(b_fc)

    prepped = {
        "emb": emb_pad,
        "w_ih_t": w_ih_t,
        "w_hh_t": w_hh_t,
        "bias": bias,
        "w_fc": w_fc_pad,
        "b_fc": b_fc_pad,
    }
    return prepped, L


@functools.partial(jax.jit, static_argnames=("num_labels",))
def simple_ner_forward(sentences, prepped, *, num_labels):
    """sentences: (B, T) int32 token ids. Returns (B, T, num_labels) f32 log-scores."""
    B, T = sentences.shape
    H = prepped["w_hh_t"].shape[0]
    LP = _LANE

    # Pad batch to the f32 sublane count so every vreg/MXU pass and the output
    # store are fully aligned (recurrence cost is flat up to B=8 anyway).
    BP = pl.cdiv(B, _SUBLANE) * _SUBLANE
    tok = jnp.zeros((BP, T), jnp.int32).at[:B, :].set(sentences.astype(jnp.int32))
    tok_tm = jnp.transpose(tok, (1, 0)).reshape(T * BP, 1)            # time-major flat

    out_flat = pl.pallas_call(
        functools.partial(_ner_kernel, T=T, B=BP, H=H),
        out_shape=jax.ShapeDtypeStruct((T * BP, LP), jnp.float32),
        in_specs=[pl.BlockSpec(memory_space=pltpu.MemorySpace.VMEM)] * 7,
        out_specs=pl.BlockSpec(memory_space=pltpu.MemorySpace.VMEM),
    )(tok_tm, prepped["emb"], prepped["w_ih_t"], prepped["w_hh_t"],
      prepped["bias"], prepped["w_fc"], prepped["b_fc"])

    # (T*BP, 128) -> (T, BP, 128) -> slice -> (B, T, L); fuses under jit.
    out_tm = out_flat.reshape(T, BP, LP)[:, :B, :num_labels]
    return jnp.transpose(out_tm, (1, 0, 2))


def _reference_forward(sentences, params):
    """Pure-JAX reference of the PyTorch forward (for correctness check)."""
    emb = params["embedding"][sentences]                              # (B, T, E)
    H = params["w_hh"].shape[1]
    w_ih_t = params["w_ih"].T
    w_hh_t = params["w_hh"].T
    bias = params["b_ih"] + params["b_hh"]

    def cell(carry, x_t):
        h, c = carry
        gates = x_t @ w_ih_t + h @ w_hh_t + bias
        i = jax.nn.sigmoid(gates[:, 0:H])
        f = jax.nn.sigmoid(gates[:, H:2 * H])
        g = jnp.tanh(gates[:, 2 * H:3 * H])
        o = jax.nn.sigmoid(gates[:, 3 * H:4 * H])
        c = f * c + i * g
        h = o * jnp.tanh(c)
        return (h, c), h

    B = sentences.shape[0]
    h0 = jnp.zeros((B, H), jnp.float32)
    _, hs = lax.scan(cell, (h0, h0), jnp.transpose(emb, (1, 0, 2)))
    hs = jnp.transpose(hs, (1, 0, 2))                                 # (B, T, H)
    logits = hs @ params["w_fc"].T + params["b_fc"]
    return jax.nn.log_softmax(logits, axis=2)


def init_params(key, vocab_size, embedding_dim, hidden_dim, num_labels):
    ks = jax.random.split(key, 7)
    s = 1.0 / jnp.sqrt(hidden_dim)
    u = lambda k, shape: jax.random.uniform(k, shape, jnp.float32, -s, s)
    return {
        "embedding": jax.random.normal(ks[0], (vocab_size, embedding_dim), jnp.float32),
        "w_ih": u(ks[1], (4 * hidden_dim, embedding_dim)),
        "w_hh": u(ks[2], (4 * hidden_dim, hidden_dim)),
        "b_ih": u(ks[3], (4 * hidden_dim,)),
        "b_hh": u(ks[4], (4 * hidden_dim,)),
        "w_fc": u(ks[5], (num_labels, hidden_dim)),
        "b_fc": u(ks[6], (num_labels,)),
    }


if __name__ == "__main__":
    vocab_size, embedding_dim, hidden_dim, num_labels = 100, 16, 32, 8
    batch, seq = 2, 8

    key = jax.random.PRNGKey(0)
    k_param, k_tok = jax.random.split(key)
    params = init_params(k_param, vocab_size, embedding_dim, hidden_dim, num_labels)
    sentences = jax.random.randint(k_tok, (batch, seq), 0, vocab_size, dtype=jnp.int32)

    prepped, n_labels = prepare_params(params)      # one-time weight prep
    out = simple_ner_forward(sentences, prepped, num_labels=n_labels)
    out = jax.block_until_ready(out)

    ref = jax.block_until_ready(_reference_forward(sentences, params))
    np.testing.assert_allclose(np.asarray(out), np.asarray(ref), rtol=1e-4, atol=1e-4)
    assert out.shape == (batch, seq, num_labels)

    print("KERNEL_OK")
</pallas_src>

<mosaic_0001>
module attributes {stable_mosaic.version = 11 : i64} {
  func.func @_ner_kernel(%arg0: memref<64x1xi32, #tpu.memory_space<vmem>>, %arg1: memref<128x16xf32, #tpu.memory_space<vmem>>, %arg2: memref<16x128xf32, #tpu.memory_space<vmem>>, %arg3: memref<32x128xf32, #tpu.memory_space<vmem>>, %arg4: memref<1x128xf32, #tpu.memory_space<vmem>>, %arg5: memref<32x128xf32, #tpu.memory_space<vmem>>, %arg6: memref<1x128xf32, #tpu.memory_space<vmem>>, %arg7: memref<64x128xf32, #tpu.memory_space<vmem>>) attributes {dimension_semantics = [], scalar_prefetch = 0 : i64, scratch_operands = 0 : i64, tpu.core_type = #tpu.core_type<tc>} {
    %c0 = arith.constant 0 : index
    %c0_0 = arith.constant 0 : index
    %0 = vector.load %arg0[%c0, %c0_0] : memref<64x1xi32, #tpu.memory_space<vmem>>, vector<64x1xi32>
    %1 = tpu.iota {dimensions = array<i32: 1>} : vector<64x128xi32>
    %2 = vector.broadcast %0 : vector<64x1xi32> to vector<64x128xi32>
    %3 = arith.cmpi eq, %1, %2 : vector<64x128xi32>
    %4 = arith.extui %3 : vector<64x128xi1> to vector<64x128xi32>
    %5 = arith.sitofp %4 : vector<64x128xi32> to vector<64x128xf32>
    %c0_1 = arith.constant 0 : index
    %c0_2 = arith.constant 0 : index
    %6 = vector.load %arg1[%c0_1, %c0_2] : memref<128x16xf32, #tpu.memory_space<vmem>>, vector<128x16xf32>
    %cst = arith.constant dense<0.000000e+00> : vector<64x16xf32>
    %7 = tpu.matmul %5, %6, %cst {dimension_numbers = #tpu.dot_dimension_numbers<[1], [0], [0], [1], [0, 0, 1, 1], [], []>} : vector<64x128xf32>, vector<128x16xf32>, vector<64x16xf32> -> vector<64x16xf32>
    %c0_3 = arith.constant 0 : index
    %c0_4 = arith.constant 0 : index
    %8 = vector.load %arg2[%c0_3, %c0_4] : memref<16x128xf32, #tpu.memory_space<vmem>>, vector<16x128xf32>
    %cst_5 = arith.constant dense<0.000000e+00> : vector<64x128xf32>
    %9 = tpu.matmul %7, %8, %cst_5 {dimension_numbers = #tpu.dot_dimension_numbers<[1], [0], [0], [1], [0, 0, 1, 1], [], []>} : vector<64x16xf32>, vector<16x128xf32>, vector<64x128xf32> -> vector<64x128xf32>
    %c0_6 = arith.constant 0 : index
    %c0_7 = arith.constant 0 : index
    %10 = vector.load %arg4[%c0_6, %c0_7] : memref<1x128xf32, #tpu.memory_space<vmem>>, vector<1x128xf32>
    %11 = vector.broadcast %10 : vector<1x128xf32> to vector<64x128xf32>
    %12 = arith.addf %9, %11 : vector<64x128xf32>
    %c0_8 = arith.constant 0 : index
    %c0_9 = arith.constant 0 : index
    %13 = vector.load %arg3[%c0_8, %c0_9] : memref<32x128xf32, #tpu.memory_space<vmem>>, vector<32x128xf32>
    %c0_10 = arith.constant 0 : index
    %c0_11 = arith.constant 0 : index
    %14 = vector.load %arg5[%c0_10, %c0_11] : memref<32x128xf32, #tpu.memory_space<vmem>>, vector<32x128xf32>
    %cst_12 = arith.constant 0.000000e+00 : f32
    %15 = vector.broadcast %cst_12 : f32 to vector<8x32xf32>
    %cst_13 = arith.constant 0.000000e+00 : f32
    %16 = vector.broadcast %cst_13 : f32 to vector<8x32xf32>
    %17 = vector.extract_strided_slice %12 {offsets = [0, 0], sizes = [8, 128], strides = [1, 1]} : vector<64x128xf32> to vector<8x128xf32>
    %cst_14 = arith.constant dense<0.000000e+00> : vector<8x128xf32>
    %18 = tpu.matmul %15, %13, %cst_14 {dimension_numbers = #tpu.dot_dimension_numbers<[1], [0], [0], [1], [0, 0, 1, 1], [], []>} : vector<8x32xf32>, vector<32x128xf32>, vector<8x128xf32> -> vector<8x128xf32>
    %19 = arith.addf %17, %18 : vector<8x128xf32>
    %20 = arith.negf %19 : vector<8x128xf32>
    %21 = math.exp %20 : vector<8x128xf32>
    %cst_15 = arith.constant 1.000000e+00 : f32
    %22 = vector.broadcast %cst_15 : f32 to vector<8x128xf32>
    %23 = arith.addf %22, %21 : vector<8x128xf32>
    %24 = arith.divf %22, %23 : vector<8x128xf32>
    %25 = math.tanh %19 : vector<8x128xf32>
    %26 = vector.extract_strided_slice %24 {offsets = [0, 0], sizes = [8, 32], strides = [1, 1]} : vector<8x128xf32> to vector<8x32xf32>
    %27 = vector.extract_strided_slice %24 {offsets = [0, 32], sizes = [8, 32], strides = [1, 1]} : vector<8x128xf32> to vector<8x32xf32>
    %28 = vector.extract_strided_slice %25 {offsets = [0, 64], sizes = [8, 32], strides = [1, 1]} : vector<8x128xf32> to vector<8x32xf32>
    %29 = vector.extract_strided_slice %24 {offsets = [0, 96], sizes = [8, 32], strides = [1, 1]} : vector<8x128xf32> to vector<8x32xf32>
    %30 = arith.mulf %27, %16 : vector<8x32xf32>
    %31 = arith.mulf %26, %28 : vector<8x32xf32>
    %32 = arith.addf %30, %31 : vector<8x32xf32>
    %33 = math.tanh %32 : vector<8x32xf32>
    %34 = arith.mulf %29, %33 : vector<8x32xf32>
    %35 = vector.extract_strided_slice %12 {offsets = [8, 0], sizes = [8, 128], strides = [1, 1]} : vector<64x128xf32> to vector<8x128xf32>
    %cst_16 = arith.constant dense<0.000000e+00> : vector<8x128xf32>
    %36 = tpu.matmul %34, %13, %cst_16 {dimension_numbers = #tpu.dot_dimension_numbers<[1], [0], [0], [1], [0, 0, 1, 1], [], []>} : vector<8x32xf32>, vector<32x128xf32>, vector<8x128xf32> -> vector<8x128xf32>
    %37 = arith.addf %35, %36 : vector<8x128xf32>
    %38 = arith.negf %37 : vector<8x128xf32>
    %39 = math.exp %38 : vector<8x128xf32>
    %cst_17 = arith.constant 1.000000e+00 : f32
    %40 = vector.broadcast %cst_17 : f32 to vector<8x128xf32>
    %41 = arith.addf %40, %39 : vector<8x128xf32>
    %42 = arith.divf %40, %41 : vector<8x128xf32>
    %43 = math.tanh %37 : vector<8x128xf32>
    %44 = vector.extract_strided_slice %42 {offsets = [0, 0], sizes = [8, 32], strides = [1, 1]} : vector<8x128xf32> to vector<8x32xf32>
    %45 = vector.extract_strided_slice %42 {offsets = [0, 32], sizes = [8, 32], strides = [1, 1]} : vector<8x128xf32> to vector<8x32xf32>
    %46 = vector.extract_strided_slice %43 {offsets = [0, 64], sizes = [8, 32], strides = [1, 1]} : vector<8x128xf32> to vector<8x32xf32>
    %47 = vector.extract_strided_slice %42 {offsets = [0, 96], sizes = [8, 32], strides = [1, 1]} : vector<8x128xf32> to vector<8x32xf32>
    %48 = arith.mulf %45, %32 : vector<8x32xf32>
    %49 = arith.mulf %44, %46 : vector<8x32xf32>
    %50 = arith.addf %48, %49 : vector<8x32xf32>
    %51 = math.tanh %50 : vector<8x32xf32>
    %52 = arith.mulf %47, %51 : vector<8x32xf32>
    %53 = vector.extract_strided_slice %12 {offsets = [16, 0], sizes = [8, 128], strides = [1, 1]} : vector<64x128xf32> to vector<8x128xf32>
    %cst_18 = arith.constant dense<0.000000e+00> : vector<8x128xf32>
    %54 = tpu.matmul %52, %13, %cst_18 {dimension_numbers = #tpu.dot_dimension_numbers<[1], [0], [0], [1], [0, 0, 1, 1], [], []>} : vector<8x32xf32>, vector<32x128xf32>, vector<8x128xf32> -> vector<8x128xf32>
    %55 = arith.addf %53, %54 : vector<8x128xf32>
    %56 = arith.negf %55 : vector<8x128xf32>
    %57 = math.exp %56 : vector<8x128xf32>
    %cst_19 = arith.constant 1.000000e+00 : f32
    %58 = vector.broadcast %cst_19 : f32 to vector<8x128xf32>
    %59 = arith.addf %58, %57 : vector<8x128xf32>
    %60 = arith.divf %58, %59 : vector<8x128xf32>
    %61 = math.tanh %55 : vector<8x128xf32>
    %62 = vector.extract_strided_slice %60 {offsets = [0, 0], sizes = [8, 32], strides = [1, 1]} : vector<8x128xf32> to vector<8x32xf32>
    %63 = vector.extract_strided_slice %60 {offsets = [0, 32], sizes = [8, 32], strides = [1, 1]} : vector<8x128xf32> to vector<8x32xf32>
    %64 = vector.extract_strided_slice %61 {offsets = [0, 64], sizes = [8, 32], strides = [1, 1]} : vector<8x128xf32> to vector<8x32xf32>
    %65 = vector.extract_strided_slice %60 {offsets = [0, 96], sizes = [8, 32], strides = [1, 1]} : vector<8x128xf32> to vector<8x32xf32>
    %66 = arith.mulf %63, %50 : vector<8x32xf32>
    %67 = arith.mulf %62, %64 : vector<8x32xf32>
    %68 = arith.addf %66, %67 : vector<8x32xf32>
    %69 = math.tanh %68 : vector<8x32xf32>
    %70 = arith.mulf %65, %69 : vector<8x32xf32>
    %71 = vector.extract_strided_slice %12 {offsets = [24, 0], sizes = [8, 128], strides = [1, 1]} : vector<64x128xf32> to vector<8x128xf32>
    %cst_20 = arith.constant dense<0.000000e+00> : vector<8x128xf32>
    %72 = tpu.matmul %70, %13, %cst_20 {dimension_numbers = #tpu.dot_dimension_numbers<[1], [0], [0], [1], [0, 0, 1, 1], [], []>} : vector<8x32xf32>, vector<32x128xf32>, vector<8x128xf32> -> vector<8x128xf32>
    %73 = arith.addf %71, %72 : vector<8x128xf32>
    %74 = arith.negf %73 : vector<8x128xf32>
    %75 = math.exp %74 : vector<8x128xf32>
    %cst_21 = arith.constant 1.000000e+00 : f32
    %76 = vector.broadcast %cst_21 : f32 to vector<8x128xf32>
    %77 = arith.addf %76, %75 : vector<8x128xf32>
    %78 = arith.divf %76, %77 : vector<8x128xf32>
    %79 = math.tanh %73 : vector<8x128xf32>
    %80 = vector.extract_strided_slice %78 {offsets = [0, 0], sizes = [8, 32], strides = [1, 1]} : vector<8x128xf32> to vector<8x32xf32>
    %81 = vector.extract_strided_slice %78 {offsets = [0, 32], sizes = [8, 32], strides = [1, 1]} : vector<8x128xf32> to vector<8x32xf32>
    %82 = vector.extract_strided_slice %79 {offsets = [0, 64], sizes = [8, 32], strides = [1, 1]} : vector<8x128xf32> to vector<8x32xf32>
    %83 = vector.extract_strided_slice %78 {offsets = [0, 96], sizes = [8, 32], strides = [1, 1]} : vector<8x128xf32> to vector<8x32xf32>
    %84 = arith.mulf %81, %68 : vector<8x32xf32>
    %85 = arith.mulf %80, %82 : vector<8x32xf32>
    %86 = arith.addf %84, %85 : vector<8x32xf32>
    %87 = math.tanh %86 : vector<8x32xf32>
    %88 = arith.mulf %83, %87 : vector<8x32xf32>
    %89 = vector.extract_strided_slice %12 {offsets = [32, 0], sizes = [8, 128], strides = [1, 1]} : vector<64x128xf32> to vector<8x128xf32>
    %cst_22 = arith.constant dense<0.000000e+00> : vector<8x128xf32>
    %90 = tpu.matmul %88, %13, %cst_22 {dimension_numbers = #tpu.dot_dimension_numbers<[1], [0], [0], [1], [0, 0, 1, 1], [], []>} : vector<8x32xf32>, vector<32x128xf32>, vector<8x128xf32> -> vector<8x128xf32>
    %91 = arith.addf %89, %90 : vector<8x128xf32>
    %92 = arith.negf %91 : vector<8x128xf32>
    %93 = math.exp %92 : vector<8x128xf32>
    %cst_23 = arith.constant 1.000000e+00 : f32
    %94 = vector.broadcast %cst_23 : f32 to vector<8x128xf32>
    %95 = arith.addf %94, %93 : vector<8x128xf32>
    %96 = arith.divf %94, %95 : vector<8x128xf32>
    %97 = math.tanh %91 : vector<8x128xf32>
    %98 = vector.extract_strided_slice %96 {offsets = [0, 0], sizes = [8, 32], strides = [1, 1]} : vector<8x128xf32> to vector<8x32xf32>
    %99 = vector.extract_strided_slice %96 {offsets = [0, 32], sizes = [8, 32], strides = [1, 1]} : vector<8x128xf32> to vector<8x32xf32>
    %100 = vector.extract_strided_slice %97 {offsets = [0, 64], sizes = [8, 32], strides = [1, 1]} : vector<8x128xf32> to vector<8x32xf32>
    %101 = vector.extract_strided_slice %96 {offsets = [0, 96], sizes = [8, 32], strides = [1, 1]} : vector<8x128xf32> to vector<8x32xf32>
    %102 = arith.mulf %99, %86 : vector<8x32xf32>
    %103 = arith.mulf %98, %100 : vector<8x32xf32>
    %104 = arith.addf %102, %103 : vector<8x32xf32>
    %105 = math.tanh %104 : vector<8x32xf32>
    %106 = arith.mulf %101, %105 : vector<8x32xf32>
    %107 = vector.extract_strided_slice %12 {offsets = [40, 0], sizes = [8, 128], strides = [1, 1]} : vector<64x128xf32> to vector<8x128xf32>
    %cst_24 = arith.constant dense<0.000000e+00> : vector<8x128xf32>
    %108 = tpu.matmul %106, %13, %cst_24 {dimension_numbers = #tpu.dot_dimension_numbers<[1], [0], [0], [1], [0, 0, 1, 1], [], []>} : vector<8x32xf32>, vector<32x128xf32>, vector<8x128xf32> -> vector<8x128xf32>
    %109 = arith.addf %107, %108 : vector<8x128xf32>
    %110 = arith.negf %109 : vector<8x128xf32>
    %111 = math.exp %110 : vector<8x128xf32>
    %cst_25 = arith.constant 1.000000e+00 : f32
    %112 = vector.broadcast %cst_25 : f32 to vector<8x128xf32>
    %113 = arith.addf %112, %111 : vector<8x128xf32>
    %114 = arith.divf %112, %113 : vector<8x128xf32>
    %115 = math.tanh %109 : vector<8x128xf32>
    %116 = vector.extract_strided_slice %114 {offsets = [0, 0], sizes = [8, 32], strides = [1, 1]} : vector<8x128xf32> to vector<8x32xf32>
    %117 = vector.extract_strided_slice %114 {offsets = [0, 32], sizes = [8, 32], strides = [1, 1]} : vector<8x128xf32> to vector<8x32xf32>
    %118 = vector.extract_strided_slice %115 {offsets = [0, 64], sizes = [8, 32], strides = [1, 1]} : vector<8x128xf32> to vector<8x32xf32>
    %119 = vector.extract_strided_slice %114 {offsets = [0, 96], sizes = [8, 32], strides = [1, 1]} : vector<8x128xf32> to vector<8x32xf32>
    %120 = arith.mulf %117, %104 : vector<8x32xf32>
    %121 = arith.mulf %116, %118 : vector<8x32xf32>
    %122 = arith.addf %120, %121 : vector<8x32xf32>
    %123 = math.tanh %122 : vector<8x32xf32>
    %124 = arith.mulf %119, %123 : vector<8x32xf32>
    %125 = vector.extract_strided_slice %12 {offsets = [48, 0], sizes = [8, 128], strides = [1, 1]} : vector<64x128xf32> to vector<8x128xf32>
    %cst_26 = arith.constant dense<0.000000e+00> : vector<8x128xf32>
    %126 = tpu.matmul %124, %13, %cst_26 {dimension_numbers = #tpu.dot_dimension_numbers<[1], [0], [0], [1], [0, 0, 1, 1], [], []>} : vector<8x32xf32>, vector<32x128xf32>, vector<8x128xf32> -> vector<8x128xf32>
    %127 = arith.addf %125, %126 : vector<8x128xf32>
    %128 = arith.negf %127 : vector<8x128xf32>
    %129 = math.exp %128 : vector<8x128xf32>
    %cst_27 = arith.constant 1.000000e+00 : f32
    %130 = vector.broadcast %cst_27 : f32 to vector<8x128xf32>
    %131 = arith.addf %130, %129 : vector<8x128xf32>
    %132 = arith.divf %130, %131 : vector<8x128xf32>
    %133 = math.tanh %127 : vector<8x128xf32>
    %134 = vector.extract_strided_slice %132 {offsets = [0, 0], sizes = [8, 32], strides = [1, 1]} : vector<8x128xf32> to vector<8x32xf32>
    %135 = vector.extract_strided_slice %132 {offsets = [0, 32], sizes = [8, 32], strides = [1, 1]} : vector<8x128xf32> to vector<8x32xf32>
    %136 = vector.extract_strided_slice %133 {offsets = [0, 64], sizes = [8, 32], strides = [1, 1]} : vector<8x128xf32> to vector<8x32xf32>
    %137 = vector.extract_strided_slice %132 {offsets = [0, 96], sizes = [8, 32], strides = [1, 1]} : vector<8x128xf32> to vector<8x32xf32>
    %138 = arith.mulf %135, %122 : vector<8x32xf32>
    %139 = arith.mulf %134, %136 : vector<8x32xf32>
    %140 = arith.addf %138, %139 : vector<8x32xf32>
    %141 = math.tanh %140 : vector<8x32xf32>
    %142 = arith.mulf %137, %141 : vector<8x32xf32>
    %143 = vector.extract_strided_slice %12 {offsets = [56, 0], sizes = [8, 128], strides = [1, 1]} : vector<64x128xf32> to vector<8x128xf32>
    %cst_28 = arith.constant dense<0.000000e+00> : vector<8x128xf32>
    %144 = tpu.matmul %142, %13, %cst_28 {dimension_numbers = #tpu.dot_dimension_numbers<[1], [0], [0], [1], [0, 0, 1, 1], [], []>} : vector<8x32xf32>, vector<32x128xf32>, vector<8x128xf32> -> vector<8x128xf32>
    %145 = arith.addf %143, %144 : vector<8x128xf32>
    %146 = arith.negf %145 : vector<8x128xf32>
    %147 = math.exp %146 : vector<8x128xf32>
    %cst_29 = arith.constant 1.000000e+00 : f32
    %148 = vector.broadcast %cst_29 : f32 to vector<8x128xf32>
    %149 = arith.addf %148, %147 : vector<8x128xf32>
    %150 = arith.divf %148, %149 : vector<8x128xf32>
    %151 = math.tanh %145 : vector<8x128xf32>
    %152 = vector.extract_strided_slice %150 {offsets = [0, 0], sizes = [8, 32], strides = [1, 1]} : vector<8x128xf32> to vector<8x32xf32>
    %153 = vector.extract_strided_slice %150 {offsets = [0, 32], sizes = [8, 32], strides = [1, 1]} : vector<8x128xf32> to vector<8x32xf32>
    %154 = vector.extract_strided_slice %151 {offsets = [0, 64], sizes = [8, 32], strides = [1, 1]} : vector<8x128xf32> to vector<8x32xf32>
    %155 = vector.extract_strided_slice %150 {offsets = [0, 96], sizes = [8, 32], strides = [1, 1]} : vector<8x128xf32> to vector<8x32xf32>
    %156 = arith.mulf %153, %140 : vector<8x32xf32>
    %157 = arith.mulf %152, %154 : vector<8x32xf32>
    %158 = arith.addf %156, %157 : vector<8x32xf32>
    %159 = math.tanh %158 : vector<8x32xf32>
    %160 = arith.mulf %155, %159 : vector<8x32xf32>
    %161 = tpu.concatenate %34, %52, %70, %88, %106, %124, %142, %160 in 0 : vector<8x32xf32>, vector<8x32xf32>, vector<8x32xf32>, vector<8x32xf32>, vector<8x32xf32>, vector<8x32xf32>, vector<8x32xf32>, vector<8x32xf32> -> vector<64x32xf32>
    %cst_30 = arith.constant dense<0.000000e+00> : vector<64x128xf32>
    %162 = tpu.matmul %161, %14, %cst_30 {dimension_numbers = #tpu.dot_dimension_numbers<[1], [0], [0], [1], [0, 0, 1, 1], [], []>} : vector<64x32xf32>, vector<32x128xf32>, vector<64x128xf32> -> vector<64x128xf32>
    %c0_31 = arith.constant 0 : index
    %c0_32 = arith.constant 0 : index
    %163 = vector.load %arg6[%c0_31, %c0_32] : memref<1x128xf32, #tpu.memory_space<vmem>>, vector<1x128xf32>
    %164 = vector.broadcast %163 : vector<1x128xf32> to vector<64x128xf32>
    %165 = arith.addf %162, %164 : vector<64x128xf32>
    %cst_33 = arith.constant dense<0xFF800000> : vector<64xf32>
    %166 = vector.multi_reduction <maximumf>, %165, %cst_33 [1] : vector<64x128xf32> to vector<64xf32>
    %167 = vector.shape_cast %166 : vector<64xf32> to vector<64x1xf32>
    %168 = vector.broadcast %167 : vector<64x1xf32> to vector<64x128xf32>
    %169 = arith.subf %165, %168 : vector<64x128xf32>
    %170 = math.exp %169 : vector<64x128xf32>
    %cst_34 = arith.constant dense<0.000000e+00> : vector<64xf32>
    %171 = vector.multi_reduction <add>, %170, %cst_34 [1] : vector<64x128xf32> to vector<64xf32>
    %172 = vector.shape_cast %171 : vector<64xf32> to vector<64x1xf32>
    %173 = math.log %172 : vector<64x1xf32>
    %174 = vector.broadcast %173 : vector<64x1xf32> to vector<64x128xf32>
    %175 = arith.subf %169, %174 : vector<64x128xf32>
    %c0_35 = arith.constant 0 : index
    %c0_36 = arith.constant 0 : index
    %176 = vector.load %arg7[%c0_35, %c0_36] : memref<64x128xf32, #tpu.memory_space<vmem>>, vector<64x128xf32>
    tpu.vector_store %arg7[%c0_35, %c0_36], %175 {strides = array<i32>} : memref<64x128xf32, #tpu.memory_space<vmem>>, vector<64x128xf32>,
    return
  }
}

</mosaic_0001>

<bundles_post_ra>
// kernel: simple_ner_forward.1
= control target key start
LH: loop header
LB: loop body
LE: loop exit
PB: predicated region body
PF: predicated region fallthrough
CT: control target
= control target key end

     0   :  { %v1860_v0 = vmov 0   ;;  %v34_v36 = vlaneseq  ;;  %v1861_v40 = vmov 1.0   ;;  %v1862_v47 = vmov 0.0|0.0   ;;  %s1866_s13 = smov 32   ;;  %s2208_s0 = inlined_call_operand.vmem [shape: s32[64,1], index: 0, kind: input, shape index: {}]   ;;  %s2209_s1 = inlined_call_operand.vmem [shape: f32[128,16], index: 1, kind: input, shape index: {}]   ;;  %s2210_s2 = inlined_call_operand.vmem [shape: f32[16,128], index: 2, kind: input, shape index: {}]   ;;  %s2211_s3 = inlined_call_operand.vmem [shape: f32[32,128], index: 3, kind: input, shape index: {}]   ;;  %s2212_s4 = inlined_call_operand.vmem [shape: f32[1,128], index: 4, kind: input, shape index: {}]   ;;  %s2213_s5 = inlined_call_operand.vmem [shape: f32[32,128], index: 5, kind: input, shape index: {}]   ;;  %s2214_s6 = inlined_call_operand.vmem [shape: f32[1,128], index: 6, kind: input, shape index: {}]   ;;  %s2215_s7 = inlined_call_operand.vmem [shape: f32[64,128], index: 7, kind: output, shape index: {}]  }
   0x1   :  { %1763 = vset.pattern.permute.xlu1 %v1860_v0  ;;  %1762 = vset.pattern.permute.xlu0 %v1860_v0  ;;  %v28_v1 = vld [vmem:[%s2208_s0 + $0x10] sm:$0xff]  ;;  %v26_v2 = vld [vmem:[%s2208_s0] sm:$0xff]  ;;  %v29_v3 = vld [vmem:[%s2208_s0 + $0x18] sm:$0xff]  ;;  %vm1863_vm8 = vmmov 0   ;;  %v1864_v54 = vmov 0.0   ;;  %vm214_vm9 = vcmask 130048  }
   0x2   :  { %43 = vperm.xlu1 %1763, %v28_v1   ;;  %37 = vperm.xlu0 %1762, %v26_v2   ;;  %v27_v4 = vld [vmem:[%s2208_s0 + $0x8] sm:$0xff]  ;;  %v84_v5 = vld [vmem:[%s2209_s1] sm:$0xff]  ;;  %v86_v7 = vld [vmem:[%s2209_s1 + $0x10] sm:$0xff]  ;;  %v35_v37 = vand.u32 127, %v34_v36  ;;  %vm352_vm10 = vcmask 261120  }
   0x3   :  { %v85_v6 = vld [vmem:[%s2209_s1 + $0x8] sm:$0xff]  ;;  %v87_v8 = vld [vmem:[%s2209_s1 + $0x18] sm:$0xff]  ;;  %v88_v11 = vld [vmem:[%s2209_s1 + $0x20] sm:$0xff] }
   0x4   :  { %v1663_v9 = vpack.c.bf16 %v85_v6, %v84_v5  ;;  %v1667_v10 = vpack.c.bf16 %v87_v8, %v86_v7  ;;  %v89_v12 = vld [vmem:[%s2209_s1 + $0x28] sm:$0xff]  ;;  %v30_v14 = vld [vmem:[%s2208_s0 + $0x20] sm:$0xff]  ;;  %v90_v16 = vld [vmem:[%s2209_s1 + $0x30] sm:$0xff] }
   0x5   :  { %v31_v13 = vld [vmem:[%s2208_s0 + $0x28] sm:$0xff]  ;;  %v1671_v15 = vpack.c.bf16 %v89_v12, %v88_v11  ;;  %v91_v17 = vld [vmem:[%s2209_s1 + $0x38] sm:$0xff]  ;;  %v32_v19 = vld [vmem:[%s2208_s0 + $0x30] sm:$0xff] }
   0x6   :  { %46 = vperm.xlu1 %1763, %v29_v3   ;;  %40 = vperm.xlu0 %1762, %v27_v4   ;;  %v33_v18 = vld [vmem:[%s2208_s0 + $0x38] sm:$0xff]  ;;  %v1675_v20 = vpack.c.bf16 %v91_v17, %v90_v16  ;;  %v92_v21 = vld [vmem:[%s2209_s1 + $0x40] sm:$0xff]  ;;  %v93_v22 = vld [vmem:[%s2209_s1 + $0x48] sm:$0xff] }
   0x7   :  { %1664 = vmatprep.subr.bf16.mxu0 %v1663_v9  ;;  %v1679_v23 = vpack.c.bf16 %v93_v22, %v92_v21  ;;  %v94_v24 = vld [vmem:[%s2209_s1 + $0x50] sm:$0xff]  ;;  %v95_v25 = vld [vmem:[%s2209_s1 + $0x58] sm:$0xff]  ;;  %v205_v26 = vld [vmem:[%s2210_s2] sm:$0xff] }
   0x8   :  { %1666 = vmatpush3.bf16.msra.mxu0 %v1663_v9  ;;  %v206_v27 = vld [vmem:[%s2210_s2 + $0x8] sm:$0xff]  ;;  %v1683_v28 = vpack.c.bf16 %v95_v25, %v94_v24  ;;  %v96_v30 = vld [vmem:[%s2209_s1 + $0x60] sm:$0xff]  ;;  %v98_v33 = vld [vmem:[%s2209_s1 + $0x70] sm:$0xff] }
   0x9   :  { %1668 = vmatprep.subr.bf16.mxu0 %v1667_v10  ;;  %v1695_v29 = vpack.c.bf16 %v206_v27, %v205_v26  ;;  %v97_v31 = vld [vmem:[%s2209_s1 + $0x68] sm:$0xff]  ;;  %v99_v34 = vld [vmem:[%s2209_s1 + $0x78] sm:$0xff]  ;;  %v344_v48 = vld [vmem:[%s2211_s3] sm:$0xff] }
   0xa   :  { %52 = vperm.xlu1 %1763, %v31_v13   ;;  %49 = vperm.xlu0 %1762, %v30_v14   ;;  %v1687_v32 = vpack.c.bf16 %v97_v31, %v96_v30  ;;  %v1691_v35 = vpack.c.bf16 %v99_v34, %v98_v33  ;;  %v345_v49 = vld [vmem:[%s2211_s3 + $0x8] sm:$0xff]  ;;  %v346_v51 = vld [vmem:[%s2211_s3 + $0x10] sm:$0xff]  ;;  %v347_v52 = vld [vmem:[%s2211_s3 + $0x18] sm:$0xff] }
   0xb   :  { %1696 = vmatprep.subr.bf16.mxu1 %v1695_v29  ;;  %v1993_v50 = vpack.c.bf16 %v345_v49, %v344_v48  ;;  %v2003_v53 = vpack.c.bf16 %v347_v52, %v346_v51  ;;  %v1376_v63 = vld [vmem:[%s2212_s4] ss:$0 sm:$0xff]  ;;  %s1865_s4 = smov 64  }
   0xc   :  { %1670 = vmatpush3.bf16.msra.mxu0 %v1667_v10  ;;  %1698 = vmatpush3.bf16.msra.mxu1 %v1695_v29 }
   0xd   :  { %1672 = vmatprep.subr.bf16.mxu0 %v1671_v15  ;;  %1699 = vmatprep.subr.bf16.mxu1 %v1862_v47 }
   0xe   :  { %58 = vperm.xlu1 %1763, %v33_v18   ;;  %55 = vperm.xlu0 %1762, %v32_v19  }
  0x10   :  { %1674 = vmatpush3.bf16.msra.mxu0 %v1671_v15 }
  0x11   :  { %1676 = vmatprep.subr.bf16.mxu0 %v1675_v20 }
  0x14   :  { %1678 = vmatpush3.bf16.msra.mxu0 %v1675_v20 }
  0x15   :  { %1680 = vmatprep.subr.bf16.mxu0 %v1679_v23 }
  0x18   :  { %1682 = vmatpush3.bf16.msra.mxu0 %v1679_v23 }
  0x19   :  { %1684 = vmatprep.subr.bf16.mxu0 %v1683_v28 }
  0x1c   :  { %1686 = vmatpush3.bf16.msra.mxu0 %v1683_v28 }
  0x1d   :  { %1688 = vmatprep.subr.bf16.mxu0 %v1687_v32 }
  0x20   :  { %1690 = vmatpush3.bf16.msra.mxu0 %v1687_v32 }
  0x21   :  { %1692 = vmatprep.subr.bf16.mxu0 %v1691_v35 }
  0x24   :  { %1694 = vmatpush3.bf16.msra.mxu0 %v1691_v35 }
  0x25   :  { %1735 = vmatprep.subr.bf16.mxu0 %v1862_v47 }
  0x81   :  { %v44_v38 = vpop.permute.xlu1 %43  ;;  %v38_v39 = vpop.permute.xlu0 %37 }
  0x82   :  { %vm60_vm0 = vcmp.eq.s32.totalorder %v35_v37, %v38_v39  ;;  %vm62_vm1 = vcmp.eq.s32.totalorder %v35_v37, %v44_v38 }
  0x83   :  { %1527 = vmatprep.mubr.msk.f32.mxu0 %vm60_vm0, %v1861_v40 }
  0x85   :  { %v47_v41 = vpop.permute.xlu1 %46  ;;  %v41_v42 = vpop.permute.xlu0 %40 }
  0x86   :  { %vm61_vm2 = vcmp.eq.s32.totalorder %v35_v37, %v41_v42  ;;  %vm63_vm3 = vcmp.eq.s32.totalorder %v35_v37, %v47_v41 }
  0x87   :  { %1528 = vmatmul.mubr.msk.f32.vlgmr.msra.gmra.mrb[0].mxu0 %vm61_vm2, %v1861_v40 }
  0x88   :  { %1530 = vmatprep.mubr.msk.f32.mxu0 %vm62_vm1, %v1861_v40  ;;  %1737 = vmatpush3.bf16.msra.mxu0 %v1993_v50 }
  0x89   :  { %v53_v43 = vpop.permute.xlu1 %52  ;;  %v50_v44 = vpop.permute.xlu0 %49  ;;  %1738 = vmatprep.subr.bf16.mxu0 %v1862_v47 }
  0x8a   :  { %vm64_vm4 = vcmp.eq.s32.totalorder %v35_v37, %v50_v44  ;;  %vm65_vm5 = vcmp.eq.s32.totalorder %v35_v37, %v53_v43 }
  0x8b   :  { %1531 = vmatmul.mubr.msk.f32.gmra.mrb[2].mxu0 %vm63_vm3, %v1861_v40 }
  0x8c   :  { %1533 = vmatprep.mubr.msk.f32.mxu0 %vm64_vm4, %v1861_v40  ;;  %1740 = vmatpush3.bf16.msra.mxu0 %v2003_v53 }
  0x8d   :  { %v56_v45 = vpop.permute.xlu0 %55  ;;  %v59_v46 = vpop.permute.xlu1 %58 }
  0x8e   :  { %vm66_vm6 = vcmp.eq.s32.totalorder %v35_v37, %v56_v45  ;;  %vm67_vm7 = vcmp.eq.s32.totalorder %v35_v37, %v59_v46 }
  0x8f   :  { %1534 = vmatmul.mubr.msk.f32.gmra.mrb[4].mxu0 %vm65_vm5, %v1861_v40 }
  0x90   :  { %1536 = vmatprep.mubr.msk.f32.mxu0 %vm66_vm6, %v1861_v40 }
  0x93   :  { %1537 = vmatmul.mubr.msk.f32.gmra.mrb[6].mxu0 %vm67_vm7, %v1861_v40 }
  0x94   :  { %1629 = vmatprep.mubr.msk.f32.mxu0 %vm1863_vm8, %v1864_v54 }
 0x15a   :  { %v1529_v55 = vpop.f32.mrb[0].mxu0 }
 0x15b   :  { %v166_v56 = vpop.f32.mrb[1].mxu0 }
 0x15c   :  { %1543 = vmatprep.mubr.msk.f32.mxu1 %vm214_vm9, %v166_v56 }
 0x15d   :  { %1544 = vmatmul.mubr.msk.f32.vlgmr.msra.gmra.mrb[0].mxu1 %vm214_vm9, %v1529_v55 }
 0x15e   :  { %1701 = vmatpush3.bf16.msra.mxu1 %v1993_v50  ;;  %v1532_v57 = vpop.f32.mrb[2].mxu0 }
 0x15f   :  { %v176_v58 = vpop.f32.mrb[3].mxu0  ;;  %1702 = vmatprep.subr.bf16.mxu1 %v1862_v47 }
 0x160   :  { %1546 = vmatprep.mubr.msk.f32.mxu1 %vm214_vm9, %v176_v58 }
 0x161   :  { %1547 = vmatmul.mubr.msk.f32.gmra.mrb[2].mxu1 %vm214_vm9, %v1532_v57 }
 0x162   :  { %v1535_v59 = vpop.f32.mrb[4].mxu0  ;;  %1704 = vmatpush3.bf16.msra.mxu1 %v2003_v53 }
 0x163   :  { %v186_v60 = vpop.f32.mrb[5].mxu0  ;;  %1705 = vmatprep.subr.bf16.mxu1 %v1862_v47 }
 0x164   :  { %1549 = vmatprep.mubr.msk.f32.mxu1 %vm214_vm9, %v186_v60 }
 0x165   :  { %1550 = vmatmul.mubr.msk.f32.gmra.mrb[4].mxu1 %vm214_vm9, %v1535_v59 }
 0x166   :  { %v1538_v61 = vpop.f32.mrb[6].mxu0 }
 0x167   :  { %v196_v62 = vpop.f32.mrb[7].mxu0 }
 0x168   :  { %1552 = vmatprep.mubr.msk.f32.mxu1 %vm214_vm9, %v196_v62 }
 0x169   :  { %1553 = vmatmul.mubr.msk.f32.gmra.mrb[6].mxu1 %vm214_vm9, %v1538_v61 }
 0x16a   :  { %1563 = vmatprep.mubr.msk.f32.mxu1 %vm1863_vm8, %v1864_v54 }
 0x16d   :  { %1564 = vmatmul.mubr.f32.vlgmr.msra.gmra.mrb[8].mxu1 %v1864_v54 }
 0x16e   :  { %1707 = vmatpush3.bf16.msra.mxu1 %v1993_v50  ;;  %1574 = vmatprep.mubr.msk.f32.mxu1 %vm1863_vm8, %v1864_v54 }
 0x16f   :  { %1708 = vmatprep.subr.bf16.mxu1 %v1862_v47 }
 0x172   :  { %1710 = vmatpush3.bf16.msra.mxu1 %v2003_v53 }
 0x173   :  { %1711 = vmatprep.subr.bf16.mxu1 %v1862_v47 }
 0x230   :  { %v1545_v0 = vpop.f32.mrb[0].mxu1 }
 0x231   :  { %v311_v1 = vadd.f32 %v1545_v0, %v1376_v63  ;;  %v305_v2 = vpop.f32.mrb[1].mxu1 }
 0x232   :  { %v306_v15 = vadd.f32 %v1376_v63, %v305_v2 }
 0x234   :  { %v1548_v3 = vpop.f32.mrb[2].mxu1 }
 0x235   :  { %v2032_v4 = vadd.f32 %v1548_v3, %v1376_v63  ;;  %v315_v5 = vpop.f32.mrb[3].mxu1 }
 0x236   :  { %v2034_v6 = vadd.f32 %v1376_v63, %v315_v5 }
 0x238   :  { %v1551_v7 = vpop.f32.mrb[4].mxu1 }
 0x239   :  { %v2036_v8 = vadd.f32 %v1551_v7, %v1376_v63  ;;  %v325_v9 = vpop.f32.mrb[5].mxu1 }
 0x23a   :  { %v2038_v10 = vadd.f32 %v1376_v63, %v325_v9 }
 0x23c   :  { %v1554_v11 = vpop.f32.mrb[6].mxu1 }
 0x23d   :  { %v2040_v12 = vadd.f32 %v1554_v11, %v1376_v63  ;;  %v335_v13 = vpop.f32.mrb[7].mxu1 }
 0x23e   :  { %v2042_v14 = vadd.f32 %v1376_v63, %v335_v13 }
 0x240   :  { %v422_v16 = vpop.f32.mrb[8].mxu1 }
 0x241   :  { %v426_v17 = vadd.f32 %v422_v16, %v306_v15  ;;  %v1565_v18 = vpop.f32.mrb[9].mxu1 }
 0x243   :  { %1764 = vtanh.f32 %v426_v17  ;;  %v1385_v20 = vmul.f32 -1.442695, %v426_v17 }
 0x245   :  { %1766 = vpow2.f32 %v1385_v20 }
 0x24d   :  { %v1765_v19 = vpop.eup %1764 }
 0x24e   :  { %436 = vrot.lane.b32.xlu0 %v1765_v19, %s1865_s4 }
 0x24f   :  { %v1767_v21 = vpop.eup %1766 }
 0x250   :  { %v430_v22 = vadd.f32 1.0, %v1767_v21 }
 0x252   :  { %1768 = vrcp.f32 %v430_v22 }
 0x25c   :  { %v1769_v23 = vpop.eup %1768 }
 0x25d   :  { %v434_v26 = vmul.f32 0.0, %v1769_v23 }
 0x2c0   :  { %v437_v24 = vpop.permute.xlu0 %436 }
 0x2c1   :  { %v439_v25 = vmul.f32 %v1769_v23, %v437_v24 }
 0x2c3   :  { %441 = vrot.lane.b32.xlu1 %v439_v25, %s1866_s13 }
 0x335   :  { %v442_v27 = vpop.permute.xlu1 %441 }
 0x336   :  { %v444_v28 = vadd.f32 %v442_v27, %v434_v26 }
 0x338   :  { %1770 = vtanh.f32 %v444_v28 }
 0x342   :  { %v1771_v29 = vpop.eup %1770 }
 0x343   :  { %447 = vrot.lane.b32.xlu0 %v1771_v29, %s1865_s4 }
 0x3b5   :  { %v448_v30 = vpop.permute.xlu0 %447 }
 0x3b6   :  { %v450_v31 = vmul.f32 %v1769_v23, %v448_v30 }
 0x3b8   :  { %452 = vrot.lane.b32.xlu1 %v450_v31, %s1866_s13 }
 0x42a   :  { %v2048_v32 = vpop.permute.xlu1 %452 }
 0x42b   :  { %1575 = vmatmul.mubr.msk.f32.vlgmr.msra.gmra.mrb[10].mxu1 %vm352_vm10, %v2048_v32 }
 0x42c   :  { %1713 = vmatpush3.bf16.msra.mxu1 %v1993_v50  ;;  %1585 = vmatprep.mubr.msk.f32.mxu1 %vm1863_vm8, %v1864_v54 }
 0x42d   :  { %1714 = vmatprep.subr.bf16.mxu1 %v1862_v47 }
 0x430   :  { %1716 = vmatpush3.bf16.msra.mxu1 %v2003_v53 }
 0x431   :  { %1717 = vmatprep.subr.bf16.mxu1 %v1862_v47 }
 0x4fe   :  { %v522_v33 = vpop.f32.mrb[10].mxu1 }
 0x4ff   :  { %v526_v34 = vadd.f32 %v522_v33, %v311_v1  ;;  %v1576_v35 = vpop.f32.mrb[11].mxu1 }
 0x501   :  { %1772 = vtanh.f32 %v526_v34  ;;  %v1387_v37 = vmul.f32 -1.442695, %v526_v34 }
 0x503   :  { %1774 = vpow2.f32 %v1387_v37 }
 0x50b   :  { %v1773_v36 = vpop.eup %1772 }
 0x50c   :  { %536 = vrot.lane.b32.xlu0 %v1773_v36, %s1865_s4 }
 0x50d   :  { %v1775_v38 = vpop.eup %1774 }
 0x50e   :  { %v530_v39 = vadd.f32 1.0, %v1775_v38 }
 0x510   :  { %1776 = vrcp.f32 %v530_v39 }
 0x51a   :  { %v1777_v40 = vpop.eup %1776 }
 0x51b   :  { %v534_v43 = vmul.f32 %v1777_v40, %v444_v28 }
 0x57e   :  { %v537_v41 = vpop.permute.xlu0 %536 }
 0x57f   :  { %v539_v42 = vmul.f32 %v1777_v40, %v537_v41 }
 0x581   :  { %541 = vrot.lane.b32.xlu1 %v539_v42, %s1866_s13 }
 0x5f3   :  { %v542_v44 = vpop.permute.xlu1 %541 }
 0x5f4   :  { %v544_v45 = vadd.f32 %v542_v44, %v534_v43 }
 0x5f6   :  { %1778 = vtanh.f32 %v544_v45 }
 0x600   :  { %v1779_v46 = vpop.eup %1778 }
 0x601   :  { %547 = vrot.lane.b32.xlu0 %v1779_v46, %s1865_s4 }
 0x673   :  { %v548_v48 = vpop.permute.xlu0 %547 }
 0x674   :  { %v550_v49 = vmul.f32 %v1777_v40, %v548_v48 }
 0x676   :  { %552 = vrot.lane.b32.xlu1 %v550_v49, %s1866_s13 }
 0x6e8   :  { %v2062_v51 = vpop.permute.xlu1 %552 }
 0x6e9   :  { %1586 = vmatmul.mubr.msk.f32.vlgmr.msra.gmra.mrb[12].mxu1 %vm352_vm10, %v2062_v51 }
 0x6ea   :  { %1719 = vmatpush3.bf16.msra.mxu1 %v1993_v50  ;;  %1596 = vmatprep.mubr.msk.f32.mxu1 %vm1863_vm8, %v1864_v54 }
 0x6eb   :  { %1720 = vmatprep.subr.bf16.mxu1 %v1862_v47 }
 0x6ee   :  { %1722 = vmatpush3.bf16.msra.mxu1 %v2003_v53 }
 0x6ef   :  { %1723 = vmatprep.subr.bf16.mxu1 %v1862_v47 }
 0x7bc   :  { %v622_v52 = vpop.f32.mrb[12].mxu1 }
 0x7bd   :  { %v626_v55 = vadd.f32 %v622_v52, %v2034_v6  ;;  %v1587_v56 = vpop.f32.mrb[13].mxu1 }
 0x7bf   :  { %1780 = vtanh.f32 %v626_v55  ;;  %v1389_v58 = vmul.f32 -1.442695, %v626_v55 }
 0x7c1   :  { %1782 = vpow2.f32 %v1389_v58 }
 0x7c9   :  { %v1781_v57 = vpop.eup %1780 }
 0x7ca   :  { %636 = vrot.lane.b32.xlu0 %v1781_v57, %s1865_s4 }
 0x7cb   :  { %v1783_v59 = vpop.eup %1782 }
 0x7cc   :  { %v630_v60 = vadd.f32 1.0, %v1783_v59  ;;  %v349_v59 = vld [vmem:[%s2213_s5 + $0x8] sm:$0xff] }
 0x7ce   :  { %1784 = vrcp.f32 %v630_v60 }
 0x7d8   :  { %v1785_v61 = vpop.eup %1784 }
 0x7d9   :  { %v634_v0 = vmul.f32 %v1785_v61, %v544_v45 }
 0x83c   :  { %v637_v62 = vpop.permute.xlu0 %636 }
 0x83d   :  { %v639_v63 = vmul.f32 %v1785_v61, %v637_v62 }
 0x83f   :  { %641 = vrot.lane.b32.xlu1 %v639_v63, %s1866_s13 }
 0x8b1   :  { %v642_v1 = vpop.permute.xlu1 %641 }
 0x8b2   :  { %v644_v2 = vadd.f32 %v642_v1, %v634_v0  ;;  %v350_v0 = vld [vmem:[%s2213_s5 + $0x10] sm:$0xff]  ;;  %v351_v1 = vld [vmem:[%s2213_s5 + $0x18] sm:$0xff] }
 0x8b4   :  { %1786 = vtanh.f32 %v644_v2 }
 0x8be   :  { %v1787_v3 = vpop.eup %1786 }
 0x8bf   :  { %647 = vrot.lane.b32.xlu0 %v1787_v3, %s1865_s4 }
 0x931   :  { %v648_v5 = vpop.permute.xlu0 %647 }
 0x932   :  { %v650_v6 = vmul.f32 %v1785_v61, %v648_v5 }
 0x934   :  { %652 = vrot.lane.b32.xlu1 %v650_v6, %s1866_s13 }
 0x9a6   :  { %v2077_v7 = vpop.permute.xlu1 %652 }
 0x9a7   :  { %1597 = vmatmul.mubr.msk.f32.vlgmr.msra.gmra.mrb[14].mxu1 %vm352_vm10, %v2077_v7 }
 0x9a8   :  { %1725 = vmatpush3.bf16.msra.mxu1 %v1993_v50  ;;  %1607 = vmatprep.mubr.msk.f32.mxu1 %vm1863_vm8, %v1864_v54 }
 0x9a9   :  { %1726 = vmatprep.subr.bf16.mxu1 %v1862_v47 }
 0x9ac   :  { %1728 = vmatpush3.bf16.msra.mxu1 %v2003_v53 }
 0x9ad   :  { %1729 = vmatprep.subr.bf16.mxu1 %v1862_v47 }
 0xa7a   :  { %v722_v9 = vpop.f32.mrb[14].mxu1 }
 0xa7b   :  { %v726_v11 = vadd.f32 %v722_v9, %v2032_v4  ;;  %v1598_v13 = vpop.f32.mrb[15].mxu1 }
 0xa7d   :  { %1788 = vtanh.f32 %v726_v11  ;;  %v1391_v16 = vmul.f32 -1.442695, %v726_v11 }
 0xa7f   :  { %1790 = vpow2.f32 %v1391_v16 }
 0xa87   :  { %v1789_v15 = vpop.eup %1788 }
 0xa88   :  { %736 = vrot.lane.b32.xlu0 %v1789_v15, %s1865_s4 }
 0xa89   :  { %v1791_v17 = vpop.eup %1790 }
 0xa8a   :  { %v730_v18 = vadd.f32 1.0, %v1791_v17 }
 0xa8c   :  { %1792 = vrcp.f32 %v730_v18 }
 0xa96   :  { %v1793_v19 = vpop.eup %1792 }
 0xa97   :  { %v734_v22 = vmul.f32 %v1793_v19, %v644_v2  ;;  %v1751_v2 = vpack.c.bf16 %v351_v1, %v350_v0 }
 0xafa   :  { %v737_v20 = vpop.permute.xlu0 %736 }
 0xafb   :  { %v739_v21 = vmul.f32 %v1793_v19, %v737_v20 }
 0xafd   :  { %741 = vrot.lane.b32.xlu1 %v739_v21, %s1866_s13 }
 0xb6f   :  { %v742_v23 = vpop.permute.xlu1 %741 }
 0xb70   :  { %v744_v24 = vadd.f32 %v742_v23, %v734_v22 }
 0xb72   :  { %1794 = vtanh.f32 %v744_v24 }
 0xb7c   :  { %v1795_v4 = vpop.eup %1794 }
 0xb7d   :  { %747 = vrot.lane.b32.xlu0 %v1795_v4, %s1865_s4 }
 0xbef   :  { %v748_v25 = vpop.permute.xlu0 %747 }
 0xbf0   :  { %v750_v26 = vmul.f32 %v1793_v19, %v748_v25 }
 0xbf2   :  { %752 = vrot.lane.b32.xlu1 %v750_v26, %s1866_s13 }
 0xc64   :  { %v2092_v27 = vpop.permute.xlu1 %752 }
 0xc65   :  { %1608 = vmatmul.mubr.msk.f32.vlgmr.msra.gmra.mrb[16].mxu1 %vm352_vm10, %v2092_v27 }
 0xc66   :  { %1731 = vmatpush3.bf16.msra.mxu1 %v1993_v50  ;;  %1618 = vmatprep.mubr.msk.f32.mxu1 %vm1863_vm8, %v1864_v54 }
 0xc67   :  { %1732 = vmatprep.subr.bf16.mxu1 %v1862_v47 }
 0xc6a   :  { %1734 = vmatpush3.bf16.msra.mxu1 %v2003_v53 }
 0xc6b   :  { %1741 = vmatprep.subr.bf16.mxu1 %v1862_v47 }
 0xd38   :  { %v822_v28 = vpop.f32.mrb[16].mxu1 }
 0xd39   :  { %v826_v29 = vadd.f32 %v822_v28, %v2038_v10  ;;  %v1609_v30 = vpop.f32.mrb[17].mxu1 }
 0xd3b   :  { %1796 = vtanh.f32 %v826_v29  ;;  %v1393_v33 = vmul.f32 -1.442695, %v826_v29 }
 0xd3d   :  { %1798 = vpow2.f32 %v1393_v33 }
 0xd45   :  { %v1797_v31 = vpop.eup %1796 }
 0xd46   :  { %836 = vrot.lane.b32.xlu0 %v1797_v31, %s1865_s4 }
 0xd47   :  { %v1799_v34 = vpop.eup %1798 }
 0xd48   :  { %v830_v35 = vadd.f32 1.0, %v1799_v34 }
 0xd4a   :  { %1800 = vrcp.f32 %v830_v35 }
 0xd54   :  { %v1801_v36 = vpop.eup %1800 }
 0xd55   :  { %v834_v39 = vmul.f32 %v1801_v36, %v744_v24 }
 0xdb8   :  { %v837_v37 = vpop.permute.xlu0 %836 }
 0xdb9   :  { %v839_v38 = vmul.f32 %v1801_v36, %v837_v37 }
 0xdbb   :  { %841 = vrot.lane.b32.xlu1 %v839_v38, %s1866_s13 }
 0xe2d   :  { %v842_v40 = vpop.permute.xlu1 %841 }
 0xe2e   :  { %v844_v41 = vadd.f32 %v842_v40, %v834_v39 }
 0xe30   :  { %1802 = vtanh.f32 %v844_v41 }
 0xe3a   :  { %v1803_v10 = vpop.eup %1802 }
 0xe3b   :  { %847 = vrot.lane.b32.xlu0 %v1803_v10, %s1865_s4  ;;  %v1400_v10 = vld [vmem:[%s2214_s6] ss:$0 sm:$0xff] }
 0xead   :  { %v848_v42 = vpop.permute.xlu0 %847 }
 0xeae   :  { %v850_v43 = vmul.f32 %v1801_v36, %v848_v42 }
 0xeb0   :  { %852 = vrot.lane.b32.xlu1 %v850_v43, %s1866_s13 }
 0xf22   :  { %v853_v44 = vpop.permute.xlu1 %852 }
 0xf23   :  { %1619 = vmatmul.mubr.msk.f32.vlgmr.msra.gmra.mrb[18].mxu1 %vm352_vm10, %v853_v44 }
 0xf24   :  { %1743 = vmatpush3.bf16.msra.mxu1 %v1993_v50  ;;  %1640 = vmatprep.mubr.msk.f32.mxu1 %vm1863_vm8, %v1864_v54 }
 0xf25   :  { %1744 = vmatprep.subr.bf16.mxu1 %v1862_v47 }
 0xf28   :  { %1746 = vmatpush3.bf16.msra.mxu1 %v2003_v53 }
 0xff6   :  { %v922_v45 = vpop.f32.mrb[18].mxu1 }
 0xff7   :  { %v926_v46 = vadd.f32 %v922_v45, %v2036_v8  ;;  %v1620_v48 = vpop.f32.mrb[19].mxu1  ;;  %v348_v8 = vld [vmem:[%s2213_s5] sm:$0xff] }
 0xff8   :  { %v1747_v60 = vpack.c.bf16 %v349_v59, %v348_v8 }
 0xff9   :  { %1804 = vtanh.f32 %v926_v46  ;;  %v1395_v52 = vmul.f32 -1.442695, %v926_v46 }
 0xffa   :  { %1748 = vmatprep.subr.bf16.mxu0 %v1747_v60 }
 0xffb   :  { %1806 = vpow2.f32 %v1395_v52 }
0x1003   :  { %v1805_v49 = vpop.eup %1804 }
0x1004   :  { %936 = vrot.lane.b32.xlu0 %v1805_v49, %s1865_s4 }
0x1005   :  { %v1807_v55 = vpop.eup %1806 }
0x1006   :  { %v930_v56 = vadd.f32 1.0, %v1807_v55 }
0x1008   :  { %1808 = vrcp.f32 %v930_v56 }
0x1012   :  { %v1809_v50 = vpop.eup %1808 }
0x1013   :  { %v934_v47 = vmul.f32 %v1809_v50, %v844_v41 }
0x1076   :  { %v937_v57 = vpop.permute.xlu0 %936 }
0x1077   :  { %v939_v54 = vmul.f32 %v1809_v50, %v937_v57 }
0x1079   :  { %941 = vrot.lane.b32.xlu1 %v939_v54, %s1866_s13 }
0x10eb   :  { %v942_v53 = vpop.permute.xlu1 %941 }
0x10ec   :  { %v944_v58 = vadd.f32 %v942_v53, %v934_v47 }
0x10ee   :  { %1810 = vtanh.f32 %v944_v58 }
0x10f8   :  { %v1811_v61 = vpop.eup %1810 }
0x10f9   :  { %947 = vrot.lane.b32.xlu0 %v1811_v61, %s1865_s4 }
0x116b   :  { %v948_v62 = vpop.permute.xlu0 %947 }
0x116c   :  { %v950_v63 = vmul.f32 %v1809_v50, %v948_v62 }
0x116e   :  { %952 = vrot.lane.b32.xlu1 %v950_v63, %s1866_s13 }
0x11e0   :  { %v953_v3 = vpop.permute.xlu1 %952 }
0x11e1   :  { %1630 = vmatmul.mubr.msk.f32.vlgmr.msra.gmra.mrb[8].mxu0 %vm352_vm10, %v953_v3 }
0x11e2   :  { %1750 = vmatpush3.bf16.msra.mxu0 %v1747_v60  ;;  %1651 = vmatprep.mubr.msk.f32.mxu0 %vm352_vm10, %v2048_v32 }
0x11e3   :  { %1752 = vmatprep.subr.bf16.mxu0 %v1751_v2 }
0x11e6   :  { %1754 = vmatpush3.bf16.msra.mxu0 %v1751_v2 }
0x11e9   :  { %1652 = vmatmul.mubr.msk.f32.vlgmr.msra.gmra.mrb[10].mxu0 %vm352_vm10, %v2062_v51 }
0x11ea   :  { %1654 = vmatprep.mubr.msk.f32.mxu0 %vm352_vm10, %v2077_v7 }
0x11ed   :  { %1655 = vmatmul.mubr.msk.f32.gmra.mrb[12].mxu0 %vm352_vm10, %v2092_v27 }
0x11ee   :  { %1657 = vmatprep.mubr.msk.f32.mxu0 %vm352_vm10, %v853_v44 }
0x11f1   :  { %1658 = vmatmul.mubr.msk.f32.gmra.mrb[14].mxu0 %vm352_vm10, %v953_v3 }
0x12b4   :  { %v1022_v5 = vpop.f32.mrb[8].mxu0 }
0x12b5   :  { %v1026_v6 = vadd.f32 %v1022_v5, %v2042_v14  ;;  %v1631_v9 = vpop.f32.mrb[9].mxu0 }
0x12b7   :  { %1812 = vtanh.f32 %v1026_v6  ;;  %v1397_v17 = vmul.f32 -1.442695, %v1026_v6 }
0x12b9   :  { %1814 = vpow2.f32 %v1397_v17 }
0x12bc   :  { %v2142_v32 = vpop.f32.mrb[10].mxu0 }
0x12bd   :  { %v1229_v11 = vpop.f32.mrb[11].mxu0  ;;  %v1235_v49 = vadd.f32 %v2142_v32, %v1400_v10 }
0x12be   :  { %v1230_v42 = vadd.f32 %v1400_v10, %v1229_v11 }
0x12c0   :  { %v1656_v13 = vpop.f32.mrb[12].mxu0 }
0x12c1   :  { %v1813_v51 = vpop.eup %1812  ;;  %v1239_v15 = vpop.f32.mrb[13].mxu0  ;;  %v1245_v44 = vadd.f32 %v1656_v13, %v1400_v10 }
0x12c2   :  { %1036 = vrot.lane.b32.xlu0 %v1813_v51, %s1865_s4  ;;  %v1240_v43 = vadd.f32 %v1400_v10, %v1239_v15 }
0x12c3   :  { %v1815_v18 = vpop.eup %1814 }
0x12c4   :  { %v1659_v7 = vpop.f32.mrb[14].mxu0  ;;  %v1030_v19 = vadd.f32 1.0, %v1815_v18 }
0x12c5   :  { %v1249_v16 = vpop.f32.mrb[15].mxu0  ;;  %v1255_v45 = vadd.f32 %v1659_v7, %v1400_v10 }
0x12c6   :  { %1816 = vrcp.f32 %v1030_v19  ;;  %v1250_v52 = vadd.f32 %v1400_v10, %v1249_v16 }
0x12d0   :  { %v1817_v20 = vpop.eup %1816 }
0x12d1   :  { %v1034_v22 = vmul.f32 %v1817_v20, %v944_v58 }
0x1334   :  { %v1037_v21 = vpop.permute.xlu0 %1036 }
0x1335   :  { %v1039_v14 = vmul.f32 %v1817_v20, %v1037_v21 }
0x1337   :  { %1041 = vrot.lane.b32.xlu1 %v1039_v14, %s1866_s13 }
0x13a9   :  { %v1042_v23 = vpop.permute.xlu1 %1041 }
0x13aa   :  { %v1044_v24 = vadd.f32 %v1042_v23, %v1034_v22 }
0x13ac   :  { %1818 = vtanh.f32 %v1044_v24 }
0x13b6   :  { %v1819_v4 = vpop.eup %1818 }
0x13b7   :  { %1047 = vrot.lane.b32.xlu0 %v1819_v4, %s1865_s4 }
0x1429   :  { %v1048_v25 = vpop.permute.xlu0 %1047 }
0x142a   :  { %v1050_v26 = vmul.f32 %v1817_v20, %v1048_v25 }
0x142c   :  { %1052 = vrot.lane.b32.xlu1 %v1050_v26, %s1866_s13 }
0x149e   :  { %v1053_v27 = vpop.permute.xlu1 %1052 }
0x149f   :  { %1641 = vmatmul.mubr.msk.f32.vlgmr.msra.gmra.mrb[20].mxu1 %vm352_vm10, %v1053_v27  ;;  %1660 = vmatprep.mubr.msk.f32.mxu0 %vm352_vm10, %v1053_v27 }
0x1572   :  { %v1122_v28 = vpop.f32.mrb[20].mxu1 }
0x1573   :  { %v1126_v29 = vadd.f32 %v1122_v28, %v2040_v12  ;;  %v1642_v30 = vpop.f32.mrb[21].mxu1 }
0x1575   :  { %1820 = vtanh.f32 %v1126_v29  ;;  %v1399_v33 = vmul.f32 -1.442695, %v1126_v29 }
0x1577   :  { %1822 = vpow2.f32 %v1399_v33 }
0x157f   :  { %v1821_v31 = vpop.eup %1820 }
0x1580   :  { %1136 = vrot.lane.b32.xlu0 %v1821_v31, %s1865_s4 }
0x1581   :  { %v1823_v34 = vpop.eup %1822 }
0x1582   :  { %v1130_v35 = vadd.f32 1.0, %v1823_v34 }
0x1584   :  { %1824 = vrcp.f32 %v1130_v35 }
0x158e   :  { %v1825_v36 = vpop.eup %1824 }
0x158f   :  { %v1134_v39 = vmul.f32 %v1825_v36, %v1044_v24 }
0x15f2   :  { %v1137_v37 = vpop.permute.xlu0 %1136 }
0x15f3   :  { %v1139_v38 = vmul.f32 %v1825_v36, %v1137_v37 }
0x15f5   :  { %1141 = vrot.lane.b32.xlu1 %v1139_v38, %s1866_s13 }
0x1667   :  { %v1142_v40 = vpop.permute.xlu1 %1141 }
0x1668   :  { %v1144_v41 = vadd.f32 %v1142_v40, %v1134_v39 }
0x166a   :  { %1826 = vtanh.f32 %v1144_v41 }
0x1674   :  { %v1827_v12 = vpop.eup %1826 }
0x1675   :  { %1147 = vrot.lane.b32.xlu0 %v1827_v12, %s1865_s4 }
0x1694   :  { %1268 = vmax.xlane.f32.xlu0 %v1230_v42 }
0x1698   :  { %1272 = vmax.xlane.f32.xlu0 %v1240_v43 }
0x169c   :  { %1274 = vmax.xlane.f32.xlu0 %v1245_v44 }
0x16a0   :  { %1278 = vmax.xlane.f32.xlu0 %v1255_v45 }
0x16e7   :  { %v1148_v46 = vpop.permute.xlu0 %1147 }
0x16e8   :  { %v1150_v48 = vmul.f32 %v1825_v36, %v1148_v46 }
0x16ea   :  { %1159 = vrot.lane.b32.xlu1 %v1150_v48, %s1866_s13 }
0x170e   :  { %1270 = vmax.xlane.f32.xlu1 %v1235_v49 }
0x1712   :  { %1276 = vmax.xlane.f32.xlu1 %v1250_v52 }
0x1721   :  { %v1269_v56 = vpop.xlane.xlu0 %1268 }
0x1722   :  { %v2162_v53 = vsub.f32 %v1230_v42, %v1269_v56 }
0x1724   :  { %v1292_v59 = vmul.f32 1.442695, %v2162_v53 }
0x1725   :  { %v1273_v50 = vpop.xlane.xlu0 %1272 }
0x1726   :  { %v2168_v60 = vsub.f32 %v1240_v43, %v1273_v50 }
0x1728   :  { %v1296_v1 = vmul.f32 1.442695, %v2168_v60 }
0x1729   :  { %v1275_v54 = vpop.xlane.xlu0 %1274 }
0x172a   :  { %v2164_v58 = vsub.f32 %v1245_v44, %v1275_v54 }
0x172c   :  { %v1298_v63 = vmul.f32 1.442695, %v2164_v58 }
0x172d   :  { %v1279_v61 = vpop.xlane.xlu0 %1278 }
0x172e   :  { %v2171_v0 = vsub.f32 %v1255_v45, %v1279_v61 }
0x1730   :  { %v1302_v3 = vmul.f32 1.442695, %v2171_v0 }
0x175c   :  { %v1160_v55 = vpop.permute.xlu1 %1159 }
0x175d   :  { %1661 = vmatmul.mubr.msk.f32.gmra.mrb[16].mxu0 %vm352_vm10, %v1160_v55 }
0x179b   :  { %v1271_v57 = vpop.xlane.xlu1 %1270 }
0x179c   :  { %v2160_v47 = vsub.f32 %v1235_v49, %v1271_v57 }
0x179e   :  { %v1294_v8 = vmul.f32 1.442695, %v2160_v47 }
0x179f   :  { %v1277_v62 = vpop.xlane.xlu1 %1276 }
0x17a0   :  { %1828 = vpow2.f32 %v1294_v8  ;;  %v2174_v2 = vsub.f32 %v1250_v52, %v1277_v62 }
0x17a1   :  { %1830 = vpow2.f32 %v1292_v59 }
0x17a2   :  { %1832 = vpow2.f32 %v1298_v63  ;;  %v1300_v6 = vmul.f32 1.442695, %v2174_v2 }
0x17a3   :  { %1834 = vpow2.f32 %v1296_v1 }
0x17a4   :  { %1836 = vpow2.f32 %v1302_v3 }
0x17a5   :  { %1838 = vpow2.f32 %v1300_v6 }
0x17aa   :  { %v1829_v13 = vpop.eup %1828 }
0x17ab   :  { %v1831_v51 = vpop.eup %1830 }
0x17ac   :  { %v1833_v15 = vpop.eup %1832 }
0x17ad   :  { %v1835_v7 = vpop.eup %1834 }
0x17ae   :  { %v1837_v16 = vpop.eup %1836 }
0x17af   :  { %v1839_v17 = vpop.eup %1838 }
0x1830   :  { %v1662_v5 = vpop.f32.mrb[16].mxu0 }
0x1831   :  { %v1265_v9 = vadd.f32 %v1662_v5, %v1400_v10  ;;  %v1259_v32 = vpop.f32.mrb[17].mxu0 }
0x1832   :  { %v1260_v11 = vadd.f32 %v1400_v10, %v1259_v32 }
0x1833   :  { %1282 = vmax.xlane.f32.xlu0 %v1265_v9 }
0x1834   :  { %1280 = vmax.xlane.f32.xlu1 %v1260_v11 }
0x1837   :  { %1310 = vadd.xlane.f32.xlu0 %v1829_v13 }
0x1838   :  { %1308 = vadd.xlane.f32.xlu1 %v1831_v51 }
0x183b   :  { %1314 = vadd.xlane.f32.xlu0 %v1833_v15 }
0x183c   :  { %1312 = vadd.xlane.f32.xlu1 %v1835_v7 }
0x183f   :  { %1318 = vadd.xlane.f32.xlu0 %v1837_v16 }
0x1840   :  { %1316 = vadd.xlane.f32.xlu1 %v1839_v17 }
0x18c0   :  { %v1283_v18 = vpop.xlane.xlu0 %1282 }
0x18c1   :  { %v1291_v19 = vsub.f32 %v1265_v9, %v1283_v18  ;;  %v1281_v20 = vpop.xlane.xlu1 %1280 }
0x18c2   :  { %v1290_v21 = vsub.f32 %v1260_v11, %v1281_v20 }
0x18c3   :  { %v1306_v14 = vmul.f32 1.442695, %v1291_v19 }
0x18c4   :  { %v1304_v22 = vmul.f32 1.442695, %v1290_v21  ;;  %v1311_v23 = vpop.xlane.xlu0 %1310 }
0x18c5   :  { %1840 = vpow2.f32 %v1306_v14  ;;  %v1309_v24 = vpop.xlane.xlu1 %1308 }
0x18c6   :  { %1842 = vpow2.f32 %v1304_v22 }
0x18c7   :  { %1844 = vlog2.f32 %v1311_v23 }
0x18c8   :  { %1846 = vlog2.f32 %v1309_v24  ;;  %v1315_v4 = vpop.xlane.xlu0 %1314 }
0x18c9   :  { %1848 = vlog2.f32 %v1315_v4  ;;  %v1313_v25 = vpop.xlane.xlu1 %1312 }
0x18ca   :  { %1850 = vlog2.f32 %v1313_v25 }
0x18cc   :  { %v1319_v26 = vpop.xlane.xlu0 %1318 }
0x18cd   :  { %1852 = vlog2.f32 %v1319_v26  ;;  %v1317_v27 = vpop.xlane.xlu1 %1316 }
0x18ce   :  { %1854 = vlog2.f32 %v1317_v27 }
0x18cf   :  { %v1841_v28 = vpop.eup %1840 }
0x18d0   :  { %v1843_v29 = vpop.eup %1842  ;;  %1322 = vadd.xlane.f32.xlu0 %v1841_v28 }
0x18d1   :  { %v1845_v30 = vpop.eup %1844  ;;  %1320 = vadd.xlane.f32.xlu1 %v1843_v29 }
0x18d2   :  { %v1847_v31 = vpop.eup %1846  ;;  %v1327_v33 = vmul.f32 0.6931472, %v1845_v30 }
0x18d3   :  { %v1849_v34 = vpop.eup %1848  ;;  %v1325_v35 = vmul.f32 0.6931472, %v1847_v31 }
0x18d4   :  { %v1851_v36 = vpop.eup %1850  ;;  %v1341_v37 = vsub.f32 %v2160_v47, %v1327_v33  ;;  %v1331_v38 = vmul.f32 0.6931472, %v1849_v34 }
0x18d5   :  { %v1340_v39 = vsub.f32 %v2162_v53, %v1325_v35  ;;  %v1329_v40 = vmul.f32 0.6931472, %v1851_v36 }
0x18d6   :  { %1349 = vst [vmem:[%s2215_s7 + $0x8] sm:$0xff] %v1341_v37  ;;  %v1343_v41 = vsub.f32 %v2164_v58, %v1331_v38 }
0x18d7   :  { %v1853_v12 = vpop.eup %1852  ;;  %1348 = vst [vmem:[%s2215_s7] sm:$0xff] %v1340_v39  ;;  %v1342_v10 = vsub.f32 %v2168_v60, %v1329_v40 }
0x18d8   :  { %v1855_v42 = vpop.eup %1854  ;;  %1351 = vst [vmem:[%s2215_s7 + $0x18] sm:$0xff] %v1343_v41  ;;  %v1335_v43 = vmul.f32 0.6931472, %v1853_v12 }
0x18d9   :  { %1350 = vst [vmem:[%s2215_s7 + $0x10] sm:$0xff] %v1342_v10  ;;  %v1333_v44 = vmul.f32 0.6931472, %v1855_v42 }
0x18da   :  { %v1345_v45 = vsub.f32 %v2171_v0, %v1335_v43 }
0x18db   :  { %v1344_v46 = vsub.f32 %v2174_v2, %v1333_v44 }
0x18dc   :  { %1353 = vst [vmem:[%s2215_s7 + $0x28] sm:$0xff] %v1345_v45 }
0x18dd   :  { %1352 = vst [vmem:[%s2215_s7 + $0x20] sm:$0xff] %v1344_v46 }
0x195d   :  { %v1323_v48 = vpop.xlane.xlu0 %1322 }
0x195e   :  { %1856 = vlog2.f32 %v1323_v48  ;;  %v1321_v49 = vpop.xlane.xlu1 %1320 }
0x195f   :  { %1858 = vlog2.f32 %v1321_v49 }
0x1968   :  { %v1857_v52 = vpop.eup %1856 }
0x1969   :  { %v1859_v55 = vpop.eup %1858  ;;  %v1339_v56 = vmul.f32 0.6931472, %v1857_v52 }
0x196a   :  { %v1337_v50 = vmul.f32 0.6931472, %v1859_v55 }
0x196b   :  { %v1347_v57 = vsub.f32 %v1291_v19, %v1339_v56 }
0x196c   :  { %v1346_v54 = vsub.f32 %v1290_v21, %v1337_v50 }
0x196d   :  { %1355 = vst [vmem:[%s2215_s7 + $0x38] sm:$0xff] %v1347_v57 }
0x196e   :  { %1354 = vst [vmem:[%s2215_s7 + $0x30] sm:$0xff] %v1346_v54 }

</bundles_post_ra>
